<compile_context>
chip_gen: v6e
topology: v6e:2x2x1
jax: 0.10.0
libtpu: 0.0.40
codegen_flags: <defaults>
</compile_context>

<pallas_src>
import functools
import math

import jax
import jax.numpy as jnp
import numpy as np
from jax.experimental import pallas as pl
from jax.experimental.pallas import tpu as pltpu


def _dn_to_distance_kernel(invk_ref, xy_ref, depth_ref, norm_ref, out_ref,
                           *, th, lanes, k):
    # invk_ref : (B*9,)          inverse intrinsics, row-major 3x3 per batch, SMEM
    # xy_ref   : (2, L)          per-lane patterns: row0 = idx % W, row1 = idx // W
    # depth_ref: (1, 1, TH, L)   VMEM tile (native dtype)
    # norm_ref : (1, 3, TH, L)   VMEM tile (native dtype)
    # out_ref  : (1, 1, TH, L)   VMEM tile
    b = pl.program_id(0)
    h = pl.program_id(1)

    f32 = jnp.float32
    d = depth_ref[0, 0].astype(f32)           # (TH, L)
    n0 = norm_ref[0, 0].astype(f32)
    n1 = norm_ref[0, 1].astype(f32)
    n2 = norm_ref[0, 2].astype(f32)

    # Pixel coordinates.  Each lane-row of length L covers k full image rows:
    #   x = lane % W                       (precomputed pattern)
    #   y = (global_row * k) + lane // W   (sublane iota + precomputed pattern)
    x = xy_ref[0:1, :]                         # (1, L), broadcasts over sublanes
    ypat = xy_ref[1:2, :]                      # (1, L)
    row = jax.lax.broadcasted_iota(jnp.int32, (th, lanes), 0)
    y = (row * k + (h * th * k)).astype(f32) + ypat   # (TH, L)

    # inv_K coefficients as SMEM scalars (sreg path; no vreg extract).
    base = b * 9
    k00 = invk_ref[base + 0]; k01 = invk_ref[base + 1]; k02 = invk_ref[base + 2]
    k10 = invk_ref[base + 3]; k11 = invk_ref[base + 4]; k12 = invk_ref[base + 5]
    k20 = invk_ref[base + 6]; k21 = invk_ref[base + 7]; k22 = invk_ref[base + 8]

    # Fold the 3x3 back-projection and the normal dot product:
    #   dist = depth * sum_c n_c * (K[c,0]*x + K[c,1]*y + K[c,2])
    a = k00 * n0 + k10 * n1 + k20 * n2
    bcoef = k01 * n0 + k11 * n1 + k21 * n2
    ccoef = k02 * n0 + k12 * n1 + k22 * n2

    dist = jnp.abs(d * (a * x + bcoef * y + ccoef))
    out_ref[0, 0] = dist.astype(out_ref.dtype)


def _sublane_pack(dtype):
    """Sublane packing multiple for a dtype (8 for f32, 16 for bf16, 32 for i8)."""
    return max(8, 32 // jnp.dtype(dtype).itemsize)


def _choose_row_tile(rows, lanes, mult, target_elems, force_split):
    """Largest legal row tile (multiple of `mult` dividing `rows`, or `rows`)
    with tile_rows * lanes <= target_elems.  If force_split, prefer tiles that
    leave >= 2 grid steps along the row axis (v7x has 2 TensorCores)."""
    cands = {rows}
    cands.update(t for t in range(mult, rows + 1, mult) if rows % t == 0)
    cands = sorted(cands)
    if force_split:
        split = [t for t in cands if rows // t >= 2]
        if split:
            cands = split
    fitting = [t for t in cands if t * lanes <= target_elems]
    return max(fitting) if fitting else min(cands)


def dn_to_distance(depth, norm_normal, inv_K, *, row_tile=None,
                   target_elems=262144):
    """depth: (B,1,H,W), norm_normal: (B,3,H,W), inv_K: (B,4,4) -> (B,1,H,W).

    Output dtype = result_type(depth, norm_normal); math is done in f32."""
    B, dc, H, W = depth.shape
    assert dc == 1 and norm_normal.shape == (B, 3, H, W)
    out_dtype = jnp.result_type(depth.dtype, norm_normal.dtype)

    # Lane-dense flat layout: fold k image rows into one lane-row of length
    # L = k*W = lcm(W, 128) when H allows; otherwise keep L = W.
    g = math.gcd(W, 128)
    k = 128 // g
    if k > 1 and H % k == 0:
        L = W * k
    else:
        k, L = 1, W
    R = (H * W) // L

    depth_r = depth.reshape(B, 1, R, L)
    norm_r = norm_normal.reshape(B, 3, R, L)
    invk_f = inv_K[:, :3, :3].reshape(B * 9).astype(jnp.float32)

    # Per-lane coordinate patterns (constant, tiny): x = lane % W, lane // W.
    lane = np.arange(L)
    xy = jnp.asarray(np.stack([(lane % W).astype(np.float32),
                               (lane // W).astype(np.float32)], axis=0))  # (2, L)

    mult = max(_sublane_pack(depth.dtype), _sublane_pack(norm_normal.dtype),
               _sublane_pack(out_dtype))
    if row_tile is None:
        th = _choose_row_tile(R, L, mult, target_elems, force_split=(B == 1))
    else:
        th = row_tile
    assert R % th == 0, "row tile must divide the folded row count"

    grid = (B, R // th)
    kernel = functools.partial(_dn_to_distance_kernel, th=th, lanes=L, k=k)

    out = pl.pallas_call(
        kernel,
        out_shape=jax.ShapeDtypeStruct((B, 1, R, L), out_dtype),
        grid=grid,
        in_specs=[
            pl.BlockSpec(memory_space=pltpu.MemorySpace.SMEM),        # inv_K (B*9,)
            pl.BlockSpec((2, L), lambda b, h: (0, 0)),                # lane patterns
            pl.BlockSpec((1, 1, th, L), lambda b, h: (b, 0, h, 0)),   # depth
            pl.BlockSpec((1, 3, th, L), lambda b, h: (b, 0, h, 0)),   # normals
        ],
        out_specs=pl.BlockSpec((1, 1, th, L), lambda b, h: (b, 0, h, 0)),
        compiler_params=pltpu.CompilerParams(
            dimension_semantics=("parallel", "parallel")),
    )(invk_f, xy, depth_r, norm_r)
    return out.reshape(B, 1, H, W)


def _make_pix_coords(batch_size, height, width):
    """The nn.Parameter pix_coords of the original module: (B, 3, H*W)."""
    xs, ys = np.meshgrid(range(width), range(height), indexing="xy")
    pix = np.stack([xs.astype(np.float32).reshape(-1),
                    ys.astype(np.float32).reshape(-1),
                    np.ones(height * width, np.float32)], axis=0)
    return jnp.asarray(np.broadcast_to(pix[None], (batch_size, 3, height * width)))


def dn_to_distance_ref(depth, norm_normal, inv_K):
    """Pure-JAX reference mirroring the PyTorch forward."""
    B, _, H, W = depth.shape
    pix_coords = _make_pix_coords(B, H, W)
    cam_points = jnp.matmul(inv_K[:, :3, :3], pix_coords)            # (B,3,HW)
    cam_points = depth.reshape(B, 1, -1) * cam_points
    distance = jnp.sum(norm_normal.reshape(B, 3, -1) * cam_points,
                       axis=1, keepdims=True)
    return jnp.abs(distance.reshape(B, 1, H, W))


if __name__ == "__main__":
    B, H, W = 2, 16, 16

    key = jax.random.PRNGKey(0)
    k1, k2, k3 = jax.random.split(key, 3)

    depth = jax.random.uniform(k1, (B, 1, H, W), jnp.float32, 0.1, 10.0)
    norm_normal = jax.random.normal(k2, (B, 3, H, W), jnp.float32)
    norm_normal = norm_normal / (
        jnp.linalg.norm(norm_normal, axis=1, keepdims=True) + 1e-6)

    # Deterministic inverse-intrinsics embedded in a 4x4 (as the module expects).
    fx, fy, cx, cy = 100.0, 120.0, W / 2.0, H / 2.0
    inv_k3 = jnp.array([[1.0 / fx, 0.0, -cx / fx],
                        [0.0, 1.0 / fy, -cy / fy],
                        [0.0, 0.0, 1.0]], jnp.float32)
    inv_K = jnp.eye(4, dtype=jnp.float32).at[:3, :3].set(inv_k3)
    inv_K = jnp.broadcast_to(inv_K[None], (B, 4, 4))
    # Small deterministic perturbation so batches differ.
    inv_K = inv_K + 1e-3 * jax.random.normal(k3, (B, 4, 4), jnp.float32)

    out = dn_to_distance(depth, norm_normal, inv_K)
    out = jax.block_until_ready(out)

    ref = dn_to_distance_ref(depth, norm_normal, inv_K)
    assert out.shape == (B, 1, H, W)
    np.testing.assert_allclose(np.asarray(out), np.asarray(ref),
                               rtol=1e-5, atol=1e-5)
    print("KERNEL_OK")
</pallas_src>

<mosaic_0001>
module attributes {stable_mosaic.version = 11 : i64} {
  func.func @_dn_to_distance_kernel(%arg0: i32, %arg1: i32, %arg2: memref<18xf32, #tpu.memory_space<smem>>, %arg3: memref<2x128xf32, #tpu.memory_space<vmem>>, %arg4: memref<1x1x2x128xf32, #tpu.memory_space<vmem>>, %arg5: memref<1x3x2x128xf32, #tpu.memory_space<vmem>>, %arg6: memref<1x1x2x128xf32, #tpu.memory_space<vmem>>) attributes {dimension_semantics = [#tpu.dimension_semantics<parallel>, #tpu.dimension_semantics<parallel>], iteration_bounds = array<i64: 2, 1>, scalar_prefetch = 0 : i64, scratch_operands = 0 : i64, tpu.core_type = #tpu.core_type<tc>, window_params = [{transform_indices = @transform_0, window_bounds = array<i64: 18>}, {pipeline_mode = #tpu.pipeline_mode<synchronous>, transform_indices = @transform_1, window_bounds = array<i64: 2, 128>}, {transform_indices = @transform_2, window_bounds = array<i64: 1, 1, 2, 128>}, {transform_indices = @transform_3, window_bounds = array<i64: 1, 3, 2, 128>}, {transform_indices = @transform_4, window_bounds = array<i64: 1, 1, 2, 128>}]} {
    %c0 = arith.constant 0 : index
    %c0_0 = arith.constant 0 : index
    %c0_1 = arith.constant 0 : index
    %c0_2 = arith.constant 0 : index
    %0 = vector.load %arg4[%c0, %c0_0, %c0_1, %c0_2] : memref<1x1x2x128xf32, #tpu.memory_space<vmem>>, vector<1x1x2x128xf32>
    %1 = vector.shape_cast %0 : vector<1x1x2x128xf32> to vector<2x128xf32>
    %c0_3 = arith.constant 0 : index
    %c0_4 = arith.constant 0 : index
    %c0_5 = arith.constant 0 : index
    %c0_6 = arith.constant 0 : index
    %2 = vector.load %arg5[%c0_3, %c0_4, %c0_5, %c0_6] : memref<1x3x2x128xf32, #tpu.memory_space<vmem>>, vector<1x1x2x128xf32>
    %3 = vector.shape_cast %2 : vector<1x1x2x128xf32> to vector<2x128xf32>
    %c0_7 = arith.constant 0 : index
    %c1 = arith.constant 1 : index
    %c0_8 = arith.constant 0 : index
    %c0_9 = arith.constant 0 : index
    %4 = vector.load %arg5[%c0_7, %c1, %c0_8, %c0_9] : memref<1x3x2x128xf32, #tpu.memory_space<vmem>>, vector<1x1x2x128xf32>
    %5 = vector.shape_cast %4 : vector<1x1x2x128xf32> to vector<2x128xf32>
    %c0_10 = arith.constant 0 : index
    %c2 = arith.constant 2 : index
    %c0_11 = arith.constant 0 : index
    %c0_12 = arith.constant 0 : index
    %6 = vector.load %arg5[%c0_10, %c2, %c0_11, %c0_12] : memref<1x3x2x128xf32, #tpu.memory_space<vmem>>, vector<1x1x2x128xf32>
    %7 = vector.shape_cast %6 : vector<1x1x2x128xf32> to vector<2x128xf32>
    %c0_13 = arith.constant 0 : index
    %c0_14 = arith.constant 0 : index
    %8 = vector.load %arg3[%c0_13, %c0_14] : memref<2x128xf32, #tpu.memory_space<vmem>>, vector<1x128xf32>
    %c1_15 = arith.constant 1 : index
    %c0_16 = arith.constant 0 : index
    %9 = vector.load %arg3[%c1_15, %c0_16] : memref<2x128xf32, #tpu.memory_space<vmem>>, vector<1x128xf32>
    %10 = tpu.iota {dimensions = array<i32: 0>} : vector<2x128xi32>
    %c8_i32 = arith.constant 8 : i32
    %11 = vector.broadcast %c8_i32 : i32 to vector<2x128xi32>
    %12 = arith.muli %10, %11 : vector<2x128xi32>
    %c2_i32 = arith.constant 2 : i32
    %13 = arith.muli %arg1, %c2_i32 : i32
    %c8_i32_17 = arith.constant 8 : i32
    %14 = arith.muli %13, %c8_i32_17 : i32
    %15 = vector.broadcast %14 : i32 to vector<2x128xi32>
    %16 = arith.addi %12, %15 : vector<2x128xi32>
    %17 = arith.sitofp %16 : vector<2x128xi32> to vector<2x128xf32>
    %18 = vector.broadcast %9 : vector<1x128xf32> to vector<2x128xf32>
    %19 = arith.addf %17, %18 : vector<2x128xf32>
    %c9_i32 = arith.constant 9 : i32
    %20 = arith.muli %arg0, %c9_i32 : i32
    %c0_i32 = arith.constant 0 : i32
    %21 = arith.addi %20, %c0_i32 : i32
    %22 = arith.index_cast %21 : i32 to index
    %23 = memref.load %arg2[%22] : memref<18xf32, #tpu.memory_space<smem>>
    %c1_i32 = arith.constant 1 : i32
    %24 = arith.addi %20, %c1_i32 : i32
    %25 = arith.index_cast %24 : i32 to index
    %26 = memref.load %arg2[%25] : memref<18xf32, #tpu.memory_space<smem>>
    %c2_i32_18 = arith.constant 2 : i32
    %27 = arith.addi %20, %c2_i32_18 : i32
    %28 = arith.index_cast %27 : i32 to index
    %29 = memref.load %arg2[%28] : memref<18xf32, #tpu.memory_space<smem>>
    %c3_i32 = arith.constant 3 : i32
    %30 = arith.addi %20, %c3_i32 : i32
    %31 = arith.index_cast %30 : i32 to index
    %32 = memref.load %arg2[%31] : memref<18xf32, #tpu.memory_space<smem>>
    %c4_i32 = arith.constant 4 : i32
    %33 = arith.addi %20, %c4_i32 : i32
    %34 = arith.index_cast %33 : i32 to index
    %35 = memref.load %arg2[%34] : memref<18xf32, #tpu.memory_space<smem>>
    %c5_i32 = arith.constant 5 : i32
    %36 = arith.addi %20, %c5_i32 : i32
    %37 = arith.index_cast %36 : i32 to index
    %38 = memref.load %arg2[%37] : memref<18xf32, #tpu.memory_space<smem>>
    %c6_i32 = arith.constant 6 : i32
    %39 = arith.addi %20, %c6_i32 : i32
    %40 = arith.index_cast %39 : i32 to index
    %41 = memref.load %arg2[%40] : memref<18xf32, #tpu.memory_space<smem>>
    %c7_i32 = arith.constant 7 : i32
    %42 = arith.addi %20, %c7_i32 : i32
    %43 = arith.index_cast %42 : i32 to index
    %44 = memref.load %arg2[%43] : memref<18xf32, #tpu.memory_space<smem>>
    %c8_i32_19 = arith.constant 8 : i32
    %45 = arith.addi %20, %c8_i32_19 : i32
    %46 = arith.index_cast %45 : i32 to index
    %47 = memref.load %arg2[%46] : memref<18xf32, #tpu.memory_space<smem>>
    %48 = vector.broadcast %23 : f32 to vector<2x128xf32>
    %49 = arith.mulf %48, %3 : vector<2x128xf32>
    %50 = vector.broadcast %32 : f32 to vector<2x128xf32>
    %51 = arith.mulf %50, %5 : vector<2x128xf32>
    %52 = arith.addf %49, %51 : vector<2x128xf32>
    %53 = vector.broadcast %41 : f32 to vector<2x128xf32>
    %54 = arith.mulf %53, %7 : vector<2x128xf32>
    %55 = arith.addf %52, %54 : vector<2x128xf32>
    %56 = vector.broadcast %26 : f32 to vector<2x128xf32>
    %57 = arith.mulf %56, %3 : vector<2x128xf32>
    %58 = vector.broadcast %35 : f32 to vector<2x128xf32>
    %59 = arith.mulf %58, %5 : vector<2x128xf32>
    %60 = arith.addf %57, %59 : vector<2x128xf32>
    %61 = vector.broadcast %44 : f32 to vector<2x128xf32>
    %62 = arith.mulf %61, %7 : vector<2x128xf32>
    %63 = arith.addf %60, %62 : vector<2x128xf32>
    %64 = vector.broadcast %29 : f32 to vector<2x128xf32>
    %65 = arith.mulf %64, %3 : vector<2x128xf32>
    %66 = vector.broadcast %38 : f32 to vector<2x128xf32>
    %67 = arith.mulf %66, %5 : vector<2x128xf32>
    %68 = arith.addf %65, %67 : vector<2x128xf32>
    %69 = vector.broadcast %47 : f32 to vector<2x128xf32>
    %70 = arith.mulf %69, %7 : vector<2x128xf32>
    %71 = arith.addf %68, %70 : vector<2x128xf32>
    %72 = vector.broadcast %8 : vector<1x128xf32> to vector<2x128xf32>
    %73 = arith.mulf %55, %72 : vector<2x128xf32>
    %74 = arith.mulf %63, %19 : vector<2x128xf32>
    %75 = arith.addf %73, %74 : vector<2x128xf32>
    %76 = arith.addf %75, %71 : vector<2x128xf32>
    %77 = arith.mulf %1, %76 : vector<2x128xf32>
    %78 = math.absf %77 : vector<2x128xf32>
    %c0_20 = arith.constant 0 : index
    %c0_21 = arith.constant 0 : index
    %c0_22 = arith.constant 0 : index
    %c0_23 = arith.constant 0 : index
    %79 = vector.load %arg6[%c0_20, %c0_21, %c0_22, %c0_23] : memref<1x1x2x128xf32, #tpu.memory_space<vmem>>, vector<1x1x2x128xf32>
    %80 = vector.shape_cast %79 : vector<1x1x2x128xf32> to vector<2x128xf32>
    %81 = vector.shape_cast %78 : vector<2x128xf32> to vector<1x1x2x128xf32>
    tpu.vector_store %arg6[%c0_20, %c0_21, %c0_22, %c0_23], %81 {strides = array<i32>} : memref<1x1x2x128xf32, #tpu.memory_space<vmem>>, vector<1x1x2x128xf32>,
    return
  }
  func.func @transform_0(%arg0: i32, %arg1: i32) -> i32 {
    %c0_i32 = arith.constant 0 : i32
    %c0_i32_0 = arith.constant 0 : i32
    return %c0_i32 : i32
  }
  func.func @transform_1(%arg0: i32, %arg1: i32) -> (i32, i32) {
    %c0_i32 = arith.constant 0 : i32
    %c0_i32_0 = arith.constant 0 : i32
    %c0_i32_1 = arith.constant 0 : i32
    return %c0_i32, %c0_i32_0 : i32, i32
  }
  func.func @transform_2(%arg0: i32, %arg1: i32) -> (i32, i32, i32, i32) {
    %c0_i32 = arith.constant 0 : i32
    %c0_i32_0 = arith.constant 0 : i32
    %c0_i32_1 = arith.constant 0 : i32
    return %arg0, %c0_i32, %arg1, %c0_i32_0 : i32, i32, i32, i32
  }
  func.func @transform_3(%arg0: i32, %arg1: i32) -> (i32, i32, i32, i32) {
    %c0_i32 = arith.constant 0 : i32
    %c0_i32_0 = arith.constant 0 : i32
    %c0_i32_1 = arith.constant 0 : i32
    return %arg0, %c0_i32, %arg1, %c0_i32_0 : i32, i32, i32, i32
  }
  func.func @transform_4(%arg0: i32, %arg1: i32) -> (i32, i32, i32, i32) {
    %c0_i32 = arith.constant 0 : i32
    %c0_i32_0 = arith.constant 0 : i32
    %c0_i32_1 = arith.constant 0 : i32
    return %arg0, %c0_i32, %arg1, %c0_i32_0 : i32, i32, i32, i32
  }
}

</mosaic_0001>

<bundles_post_ra>
// kernel: tpu_custom_call.1
= control target key start
LH: loop header
LB: loop body
LE: loop exit
PB: predicated region body
PF: predicated region fallthrough
CT: control target
= control target key end

     0   :  { %s1053_s0 = inlined_call_operand.hbm [shape: f32[18], index: 0, kind: input, shape index: {}]   ;;  %s1054_s1 = inlined_call_operand.hbm [shape: f32[2,128], index: 1, kind: input, shape index: {}]   ;;  %s1055_s2 = inlined_call_operand.hbm [shape: f32[2,1,2,128], index: 2, kind: input, shape index: {}]   ;;  %s1056_s3 = inlined_call_operand.hbm [shape: f32[2,3,2,128], index: 3, kind: input, shape index: {}]   ;;  %s1057_s4 = inlined_call_operand.hbm [shape: f32[2,1,2,128], index: 4, kind: output, shape index: {}]  }
   0x1   :  { %1060 = sst [smem:[#allocation15_spill]] %s1053_s0 }
   0x2   :  { %1061 = sst [smem:[#allocation16_spill]] %s1054_s1 }
   0x3   :  { %1062 = sst [smem:[#allocation17_spill]] %s1055_s2 }
   0x4   :  { %1063 = sst [smem:[#allocation18_spill]] %s1056_s3 }
   0x5   :  { %9 = vsyncpa [#allocation5], 0 }
   0x6   :  { %10 = vsyncpa [#allocation3], 0 }
   0x7   :  { %11 = vsyncpa [#allocation8], 0 }
   0x8   :  { %13 = vsyncpa [#allocation8 + $0x1], 0 }
   0x9   :  { %14 = vsyncpa [#allocation4], 0 }
   0xa   :  { %16 = vsyncpa [#allocation4 + $0x1], 0  ;;  %s839_s15 = smov 0   ;;  %s841_s16 = smov 0  }
   0xb   :  { %s843_s17 = smov 0   ;;  %s845_s18 = smov 0  }
   0xc   :  { %s847_s19 = smov 0   ;;  %s849_s20 = smov 0  }
   0xd LB: > { %s34_s21 = sadd.s32 1, %s801_s19  ;;  %s85_s22 = sadd.s32 1, %s793_s17  ;;  %s805_s20 = sphi %s849_s20, %s22_s20   ;;  %s801_s19 = sphi %s847_s19, %s1082_s19   ;;  %s797_s18 = sphi %s845_s18, %s1081_s18   ;;  %s793_s17 = sphi %s843_s17, %s1080_s17   ;;  %s789_s16 = sphi %s841_s16, %s1079_s16   ;;  %s785_s15 = sphi %s839_s15, %s1078_s15  }
   0xe   : > { %p36_p0 = scmp.ge.s32.totalorder %s34_s21, 2  ;;  %p92_p1 = scmp.ne.s32.totalorder %s793_s17, %s789_s16 }
   0xf   : > { %p93_p2 = scmp.eq.s32.totalorder %s805_s20, 0  ;;  %p568_p5 = scmp.lt.s32.totalorder %s805_s20, 2 }
  0x10   : > { %s1084_s21 = smov (%p36_p0, %s34_s21), 0  ;;  %s198_s24 = sand.u32 1, %s805_s20  }
  0x11   : > { %p94_p4 = por %p93_p2, %p92_p1  ;;  %s80_s23 = ssub.s32 %s801_s19, %s1084_s21 }
  0x12   : > { %p83_p6 = scmp.eq.s32.totalorder %s80_s23, 0  ;;  %s200_s25 = sand.u32 1, %s793_s17  }
  0x13   : > { %s516_s26 = sshll.u32 %s801_s19, 5  ;;  %s515_s28 = sshll.u32 %s200_s25, 1 }
  0x14   : > { %s887_s27 = scalar_select %p83_p6, %s793_s17, %s85_s22  }
  0x15   : > { %s1064_s2 = sld [smem:[#allocation17_spill]]  ;;  %p892_p7 = pnand %p568_p5, %p94_p4 }
  0x16   : > { %s202_s7 = scalar_lea.vmem [#allocation7], %s515_s28  ;;  %s531_s9 = smul.u32 6, %s200_s25 }
  0x17   : > { %s210_s8 = sshll.u32 %s202_s7, 4  ;;  %s896_s10 = scalar_lea.sflag [#allocation8], %s198_s24  ;;  %s211_s8 = int_to_ptr.vmem [resolvable:$true] %s210_s8 }
  0x18   : > { %p626_p8 = pneg %p892_p7  ;;  %s637_s11 = scalar_lea.vmem %s211_s8, 32 }
  0x19   : > { %p638_p9 = scmp.ne.s32.totalorder %s211_s8, %s637_s11  ;;  %s807_s12 = smov [#allocation7]  }
  0x1a   : > { %s642_s13 = sshll.u32 %s807_s12, 4  ;;  %s643_s13 = int_to_ptr.vmem [resolvable:$false] %s642_s13 }
  0x1b   : > { %s208_s5 = scalar_lea.hbm %s1064_s2, %s516_s26  ;;  %p640_p10 = pnand %p638_p9, %p626_p8 }
  0x1c   : > { %s644_s14 = scalar_lea.vmem %s643_s13, 64  ;;  %p645_p12 = scmp.lt.s32.totalorder %s211_s8, %s643_s13 }
  0x1d   : > { %p641_p11 = pneg %p640_p10  ;;  %p646_p13 = scmp.lt.s32.totalorder %s644_s14, %s637_s11 }
  0x1f   : > { %p647_p0 = por %p646_p13, %p645_p12 }
  0x21   : > { %p648_p2 = pnand %p647_p0, %p641_p11 }
  0x23   : > { %651 = shalt.err (!%p648_p2)
}
  0x24   : > { %558 = dma.hbm_to_vmem [thread:$0]  (!%p892_p7), %s208_s5, 32, %s211_s8, %s896_s10  }
  0x25   : > { %s532_s22 = smul.u32 96, %s801_s19  ;;  %s221_s23 = scalar_lea.vmem [#allocation9], %s531_s9 }
  0x26   : > { %s229_s24 = sshll.u32 %s221_s23, 4  ;;  %s908_s25 = sadd.s32 4294967295, %s805_s20   ;;  %s230_s24 = int_to_ptr.vmem [resolvable:$true] %s229_s24 }
  0x27   : > { %s510_s26 = sadd.s32 4294967294, %s805_s20   ;;  %p98_p4 = scmp.ne.s32.totalorder %s789_s16, %s785_s15 }
  0x28   : > { %p99_p5 = scmp.eq.s32.totalorder %s908_s25, 0  ;;  %p152_p6 = scmp.eq.s32.totalorder %s908_s25, 1 }
  0x29   : > { %p158_p9 = scmp.eq.s32.totalorder %s510_s26, 1  ;;  %p511_p11 = scmp.ge.s32.totalorder %s805_s20, 1 }
  0x2a   : > { %p917_p10 = por %p99_p5, %p98_p4  ;;  %p925_p12 = por %p152_p6, %p92_p1 }
  0x2b   : > { %p929_p13 = por %p158_p9, %p98_p4  ;;  %p165_p0 = scmp.lt.s32.totalorder %s805_s20, 3 }
  0x2c   : > { %s1067_s29 = scalar_select %p925_p12, 1, 0 }
  0x2d   : > { %s1068_s30 = scalar_select %p929_p13, 1, 0 }
  0x2e   : > { %p934_p2 = pnand %p511_p11, %p165_p0  ;;  %s808_s7 = smov [#allocation6]  }
  0x2f   : > { %s187_s8 = sshll.u32 %s808_s7, 4  ;;  %s1070_s3 = sld [smem:[#allocation18_spill]]  ;;  %s949_s8 = int_to_ptr.vmem [resolvable:$true] %s187_s8 }
  0x30   : > { %p548_p1 = pneg %p934_p2  ;;  %s665_s14 = scalar_lea.vmem %s230_s24, 96 }
  0x31   : > { %p666_p6 = scmp.ne.s32.totalorder %s230_s24, %s665_s14  ;;  %s809_s23 = smov [#allocation9]  }
  0x32   : > { %p945_p4 = pnand %p548_p1, %p99_p5  ;;  %s670_s26 = sshll.u32 %s809_s23, 4  ;;  %s671_s26 = int_to_ptr.vmem [resolvable:$false] %s670_s26 }
  0x33   : > { %p668_p9 = pnand %p666_p6, %p626_p8  ;;  %s672_s7 = scalar_lea.vmem %s671_s26, 192 }
  0x34   : > { %p673_p0 = scmp.lt.s32.totalorder %s230_s24, %s671_s26  ;;  %p674_p3 = scmp.lt.s32.totalorder %s672_s7, %s665_s14 }
  0x35   : > { %s228_s12 = scalar_lea.hbm %s1070_s3, %s532_s22  ;;  %p669_p11 = pneg %p668_p9 }
  0x36   : > { %p675_p13 = por %p674_p3, %p673_p0 }
  0x38   : > { %p676_p12 = pnand %p675_p13, %p669_p11 }
  0x3a   : > { %679 = shalt.err (!%p676_p12)
}
  0x3b   : > { %s810_s22 = smov 32   ;;  %s811_s9 = smov 2  }
  0x3c   : > { %561 = dma.hbm_to_vmem [thread:$0]  (!%p892_p7), %s228_s12, 96, %s230_s24, %s896_s10, %s810_s22, %s810_s22, %s811_s9  }
  0x3d   : > { %s812_s11 = smov [#allocation2]   ;;  %s1072_s0 = sld [smem:[#allocation15_spill]] }
  0x3e   : > { %p693_p3 = pneg %p945_p4  ;;  %s702_s14 = scalar_lea.vmem %s949_s8, 32 }
  0x3f   : > { %p703_p8 = scmp.ne.s32.totalorder %s949_s8, %s702_s14  ;;  %p710_p1 = scmp.lt.s32.totalorder %s949_s8, %s949_s8 }
  0x40   : > { %p711_p6 = scmp.lt.s32.totalorder %s702_s14, %s702_s14 }
  0x41   : > { %p705_p12 = pnand %p703_p8, %p693_p3 }
  0x42   : > { %p712_p9 = por %p711_p6, %p710_p1 }
  0x43   : > { %551 = dma.hbm_to_smem (!%p945_p4), %s1072_s0, 16, %s812_s11, [#allocation5]  }
  0x44   : > { %p706_p13 = pneg %p705_p12 }
  0x46   : > { %p713_p11 = pnand %p712_p9, %p706_p13 }
  0x48   : > { %716 = shalt.err (!%p713_p11)
}
  0x49   : > { %s1073_s1 = sld [smem:[#allocation16_spill]] }
  0x4b   : > { %241 = sbr.rel (%p934_p2) target bundleno = 134 (0x86), region = 36 }
  0x4f   : > { %554 = dma.hbm_to_vmem [thread:$0]  (!%p945_p4), %s1073_s1, 32, %s949_s8, [#allocation3]  }
  0x50   : > { %768 = dma.done.wait (%p99_p5), [#allocation5], 16  }
  0x51   : > { %770 = vsyncadd (%p99_p5), [#allocation5], 4294967280 }
  0x52   : > { %772 = dma.done.wait (%p99_p5), [#allocation3], 32  }
  0x53   : > { %774 = vsyncadd (%p99_p5), [#allocation3], 4294967264  ;;  %s251_s2 = sand.u32 1, %s908_s25   ;;  %s986_s24 = sand.u32 1, %s789_s16  }
  0x54   : > { %s1059_s5 = sshll.u32 %s986_s24, 1  ;;  %s252_s8 = scalar_lea.sflag [#allocation8], %s251_s2 }
  0x55   : > { %s991_s12 = scalar_lea.vmem [#allocation7], %s1059_s5 }
  0x56   : > { %776 = dma.done.wait (%p917_p10), %s252_s8, 128  }
  0x57   : > { %778 = vsyncadd (%p917_p10), %s252_s8, 4294967168  ;;  %s533_s13 = smul.u32 6, %s986_s24 }
  0x59   : > { %s998_s26 = scalar_lea.vmem [#allocation9], %s533_s13 }
  0x5a   : > { %269 = sfence }
  0x5b   : > { %v303_v0 = vlaneseq  ;;  %s315_s25 = smul.u32 9, %s797_s18  ;;  %v296_v2 = vld [vmem:[%s998_s26] sm:$0x3]  ;;  %v523_v5 = vld [vmem:[%s998_s26 + $0x2] sm:$0x3]  ;;  %p1075_p5 = scmp.ne.s32.totalorder %s1067_s29, 0 }
  0x5c   : > { %v524_v11 = vld [vmem:[%s998_s26 + $0x4] sm:$0x3]  ;;  %v525_v16 = vld [vmem:[#allocation6 + $0x1] ss:$0 sm:$0xff]  ;;  %v526_v25 = vld [vmem:[#allocation6] ss:$0 sm:$0xff] }
  0x5d   : > { %s316_s7 = sld [smem:[#allocation2 + %s315_s25]]  ;;  %s317_s22 = sadd.s32 1, %s315_s25  ;;  %v304_v1 = vshrl.u32 %v303_v0, 7  ;;  %v295_v37 = vld [vmem:[%s991_s12] sm:$0x3] }
  0x5e   : > { %s318_s9 = sld [smem:[#allocation2 + %s317_s22]]  ;;  %s319_s11 = sadd.s32 2, %s315_s25 }
  0x5f   : > { %s320_s23 = sld [smem:[#allocation2 + %s319_s11]]  ;;  %s321_s14 = sadd.s32 3, %s315_s25  ;;  %v305_v3 = vmul.u32 8, %v304_v1 }
  0x60   : > { %s322_s6 = sld [smem:[#allocation2 + %s321_s14]]  ;;  %s323_s28 = sadd.s32 4, %s315_s25 }
  0x61   : > { %s324_s10 = sld [smem:[#allocation2 + %s323_s28]]  ;;  %s325_s2 = sadd.s32 5, %s315_s25  ;;  %v309_v12 = vcvt.s32.f32 %v305_v3 }
  0x62   : > { %s326_s8 = sld [smem:[#allocation2 + %s325_s2]]  ;;  %s327_s13 = sadd.s32 6, %s315_s25 }
  0x63   : > { %s328_s5 = sld [smem:[#allocation2 + %s327_s13]]  ;;  %s329_s0 = sadd.s32 7, %s315_s25  ;;  %v333_v4 = vstv %s316_s7  ;;  %v314_v26 = vadd.f32 %v525_v16, %v309_v12 }
  0x64   : > { %s330_s1 = sld [smem:[#allocation2 + %s329_s0]]  ;;  %s331_s22 = sadd.s32 8, %s315_s25  ;;  %v341_v6 = vstv %s318_s9  ;;  %v334_v7 = vmul.f32 %v333_v4, %v296_v2 }
  0x65   : > { %s332_s3 = sld [smem:[#allocation2 + %s331_s22]]  ;;  %v349_v8 = vstv %s320_s23  ;;  %v342_v10 = vmul.f32 %v341_v6, %v296_v2  ;;  %s1074_s0 = sshll.u32 %s986_s24, 1 }
  0x66   : > { %v335_v9 = vstv %s322_s6  ;;  %v350_v15 = vmul.f32 %v349_v8, %v296_v2  ;;  %s528_s26 = sshll.u32 %s797_s18, 5  ;;  %s369_s9 = scalar_lea.sflag [#allocation4], %s986_s24 }
  0x67   : > { %v336_v13 = vmul.f32 %v523_v5, %v335_v9  ;;  %v343_v14 = vstv %s324_s10  ;;  %s381_s7 = scalar_lea.hbm %s1057_s4, %s528_s26  ;;  %s813_s12 = smov [#allocation10]  }
  0x68   : > { %v344_v17 = vmul.f32 %v523_v5, %v343_v14  ;;  %v351_v18 = vstv %s326_s8  ;;  %s721_s18 = sshll.u32 %s813_s12, 4  ;;  %s722_s18 = int_to_ptr.vmem [resolvable:$false] %s721_s18 }
  0x69   : > { %v337_v19 = vadd.f32 %v336_v13, %v334_v7  ;;  %v338_v20 = vstv %s328_s5  ;;  %v352_v21 = vmul.f32 %v523_v5, %v351_v18  ;;  %s294_s5 = scalar_lea.vmem [#allocation10], %s1074_s0  ;;  %s723_s23 = scalar_lea.vmem %s722_s18, 64 }
  0x6a   : > { %v339_v22 = vmul.f32 %v524_v11, %v338_v20  ;;  %v345_v23 = vadd.f32 %v344_v17, %v342_v10  ;;  %v346_v24 = vstv %s330_s1  ;;  %s383_s1 = sshll.u32 %s294_s5, 4  ;;  %s1008_s1 = int_to_ptr.vmem [resolvable:$true] %s383_s1 }
  0x6b   : > { %v347_v27 = vmul.f32 %v524_v11, %v346_v24  ;;  %v353_v28 = vadd.f32 %v352_v21, %v350_v15  ;;  %v354_v29 = vstv %s332_s3  ;;  %s717_s11 = scalar_lea.vmem %s1008_s1, 32  ;;  %p724_p4 = scmp.lt.s32.totalorder %s1008_s1, %s722_s18 }
  0x6c   : > { %v340_v30 = vadd.f32 %v339_v22, %v337_v19  ;;  %v355_v31 = vmul.f32 %v524_v11, %v354_v29  ;;  %p718_p7 = scmp.ne.s32.totalorder %s1008_s1, %s717_s11  ;;  %p725_p0 = scmp.lt.s32.totalorder %s723_s23, %s717_s11 }
  0x6d   : > { %v348_v32 = vadd.f32 %v347_v27, %v345_v23 }
  0x6e   : > { %v361_v33 = vmul.f32 %v526_v25, %v340_v30  ;;  %v356_v34 = vadd.f32 %v355_v31, %v353_v28  ;;  %p719_p10 = pnand %p718_p7, %p1075_p5  ;;  %p726_p3 = por %p725_p0, %p724_p4 }
  0x6f   : > { %v362_v35 = vmul.f32 %v348_v32, %v314_v26 }
  0x70   : > { %p720_p2 = pneg %p719_p10 }
  0x71   : > { %v363_v36 = vadd.f32 %v362_v35, %v361_v33 }
  0x72   : > { %p727_p8 = pnand %p726_p3, %p720_p2 }
  0x73   : > { %v364_v38 = vadd.f32 %v363_v36, %v356_v34 }
  0x75   : > { %v365_v39 = vmul.f32 %v364_v38, %v295_v37 }
  0x77   : > { %v366_v40 = vand.u32 2147483647, %v365_v39 }
  0x79   : > { %367 = vst [vmem:[%s294_s5] sm:$0x3] %v366_v40 }
  0x7a   : > { %730 = shalt.err (!%p727_p8)
}
  0x7b   : > { %s731_s14 = scalar_lea.hbm %s381_s7, 32  ;;  %s735_s28 = scalar_lea.hbm %s1057_s4, 64 }
  0x7c   : > { %p732_p12 = scmp.ne.s32.totalorder %s381_s7, %s731_s14  ;;  %p736_p6 = scmp.lt.s32.totalorder %s381_s7, %s1057_s4 }
  0x7d   : > { %p737_p9 = scmp.lt.s32.totalorder %s735_s28, %s731_s14 }
  0x7e   : > { %p733_p13 = pnand %p732_p12, %p1075_p5 }
  0x7f   : > { %p738_p11 = por %p737_p9, %p736_p6 }
  0x80   : > { %p734_p1 = pneg %p733_p13 }
  0x82   : > { %p739_p7 = pnand %p738_p11, %p734_p1 }
  0x84   : > { %742 = shalt.err (!%p739_p7)
}
  0x85   : > { %546 = dma.vmem_to_hbm [thread:$0]  (%p1075_p5), %s1008_s1, 32, %s381_s7, %s369_s9  }
  0x86 PF: > { %s395_s8 = sand.u32 1, %s785_s15   ;;  %p1076_p10 = scmp.ne.s32.totalorder %s1068_s30, 0 }
  0x87   : > { %p1077_p2 = scmp.ge.s32.totalorder %s805_s20, 2  ;;  %s396_s13 = scalar_lea.sflag [#allocation4], %s395_s8 }
  0x89   : > { %p563_p4 = pnand %p1077_p2, %p1076_p10 }
  0x8b   : > { %p564_p0 = pneg %p563_p4 }
  0x8d   : > { %780 = dma.done.wait (%p564_p0), %s396_s13, 32  }
  0x8e   : > { %782 = vsyncadd (%p564_p0), %s396_s13, 4294967264  ;;  %s22_s20 = sadd.s32 1, %s805_s20   ;;  %s1078_s15 = smov %s789_s16 }
  0x8f   : > { %p19_p3 = scmp.ge.s32.totalorder %s22_s20, 4   ;;  %s1079_s16 = smov %s793_s17 }
  0x90   : > { %s1080_s17 = smov %s887_s27  ;;  %s1081_s18 = smov %s801_s19 }
  0x91   : > { %s1082_s19 = smov %s1084_s21  ;;  %21 = sbr.rel (!%p19_p3) target bundleno = 13 (0xd), region = 104 }
  0x96   :  { %401 = vsyncpa [#allocation3], 1 }
  0x97   :  { %403 = vsyncpa [#allocation3 + $0x1], 1 }
  0x98   :  { %404 = vsyncpa [#allocation8], 1 }
  0x99   :  { %406 = vsyncpa [#allocation8 + $0x1], 1 }
  0x9a   :  { %407 = vsyncpa [#allocation4], 1 }
  0x9b   :  { %409 = vsyncpa [#allocation4 + $0x1], 1 }
  0x9c   :  { %410 = vsyncpa [#allocation5], 1 }
  0x9d   :  { %412 = vsyncpa [#allocation5 + $0x1], 1 }

</bundles_post_ra>
